<compile_context>
chip_gen: v7x
topology: tpu7x:2x2x1
jax: 0.10.0
libtpu: 0.0.40
codegen_flags: <defaults>
</compile_context>

<pallas_src>
import jax
import jax.numpy as jnp
from jax.experimental import pallas as pl
from jax.experimental.pallas import tpu as pltpu

_LANE = 128
_TARGET_BLOCK_BYTES = 2 * 1024 * 1024   # per-input live block; x2 inputs x2 buffers = 8 MiB


def _make_iou_kernel(tb, tm, tail_rows, bf16_elementwise):
    """Per-(batch-tile, m-tile) kernel body. All args are static Python values."""

    def _partials(p, t):
        # p, t: (tb, tm, 128) in the load dtype.
        if bf16_elementwise:
            prod = (p * t).astype(jnp.float32)   # native bf16 VPU mul/add (v6e/v7x)
            sums = (p + t).astype(jnp.float32)
        else:
            p32 = p.astype(jnp.float32)
            t32 = t.astype(jnp.float32)
            prod = p32 * t32
            sums = p32 + t32
        # Fold only the m-tile axis: keep lane-dense (tb, 128) partials, so no
        # cross-lane reduce / scalar extraction happens in the steady state.
        return jnp.sum(prod, axis=1), jnp.sum(sums, axis=1)

    def kernel(p_ref, t_ref, o_ref, iand_ref, ssum_ref):
        j = pl.program_id(1)
        last = pl.num_programs(1) - 1

        @pl.when(j == 0)
        def _():
            iand_ref[...] = jnp.zeros_like(iand_ref)
            ssum_ref[...] = jnp.zeros_like(ssum_ref)

        def _accumulate(mask_tail):
            p = p_ref[...]
            t = t_ref[...]
            if mask_tail:
                # Only the ragged last m-tile pays for the iota + selects.
                row = jax.lax.broadcasted_iota(jnp.int32, (tb, tm, _LANE), 1)
                valid = row < tail_rows          # tile-local remainder
                p = jnp.where(valid, p, 0.0)
                t = jnp.where(valid, t, 0.0)
            ia, ss = _partials(p, t)
            iand_ref[...] += ia
            ssum_ref[...] += ss

        if tail_rows:
            @pl.when(j != last)
            def _():
                _accumulate(False)               # unmasked fast path (steady state)

            @pl.when(j == last)
            def _():
                _accumulate(True)                # masked path, last tile only
        else:
            _accumulate(False)

        @pl.when(j == last)
        def _():
            # One cross-lane reduce per sample-block, only at the end.
            ia = jnp.sum(iand_ref[...], axis=1, keepdims=True)   # (tb, 1)
            ss = jnp.sum(ssum_ref[...], axis=1, keepdims=True)
            ior = ss - ia            # union = sum(p) + sum(t) - intersection
            # Matches the PyTorch loop exactly: no epsilon guard (union == 0 -> inf/nan).
            val = jnp.float32(1.0) - ia / ior
            o_ref[...] = jnp.broadcast_to(val, (tb, _LANE)).astype(o_ref.dtype)

    return kernel


def _pick_tiles(b, m, rows_target):
    """Choose (tb, tm): samples per block and 128-lane rows per block."""
    if m >= rows_target:
        return 1, rows_target                    # big samples: tile the reduction axis
    # Small samples: take the whole sample (tm = m) and batch several samples
    # per block so each grid step still moves ~_TARGET_BLOCK_BYTES of HBM.
    tb = max(1, rows_target // m)
    if tb >= b:
        return b, m
    if tb >= 8:
        return (tb // 8) * 8, m                  # keep the out-block sublanes 8-aligned
    return 1, m


def iou_loss(pred, target, *, block_rows=None):
    """Pallas equivalent of the PyTorch IOU module forward (scalar loss)."""
    assert pred.shape == target.shape, "pred/target shape mismatch"
    assert pred.dtype == target.dtype, "pred/target dtype mismatch"

    b = pred.shape[0]
    n = 1
    for d in pred.shape[1:]:
        n *= d
    m = pl.cdiv(n, _LANE)                        # 128-lane rows per sample
    padded = (m * _LANE) != n

    def prep(x):
        x = x.reshape(b, n)                      # free (contiguous) reshape, native dtype
        if padded:
            # <128 zeros per sample; with allow_input_fusion XLA can fuse this
            # pad into the pallas_call operand instead of materializing a copy.
            x = jnp.pad(x, ((0, 0), (0, m * _LANE - n)))
        return x.reshape(b, m, _LANE)

    p = prep(pred)
    t = prep(target)

    itemsize = pred.dtype.itemsize
    if block_rows is None:
        rows_target = max(8, (_TARGET_BLOCK_BYTES // (itemsize * _LANE)) // 8 * 8)
    else:
        rows_target = max(8, (block_rows // 8) * 8)

    tb, tm = _pick_tiles(b, m, rows_target)
    gb = pl.cdiv(b, tb)
    gm = pl.cdiv(m, tm)
    tail_rows = m % tm                           # nonzero only on the tb == 1 path

    kernel = _make_iou_kernel(tb, tm, tail_rows,
                              bf16_elementwise=(pred.dtype == jnp.bfloat16))

    cost = pl.CostEstimate(flops=3 * b * m * _LANE, transcendentals=0,
                           bytes_accessed=2 * b * n * itemsize + b * _LANE * 4)

    # Note (v7x): with b == 1 only one TensorCore gets work; splitting the m axis
    # into per-core partial outputs would recover ~2x there (no effect on v5e/v6e).
    per_sample = pl.pallas_call(
        kernel,
        out_shape=jax.ShapeDtypeStruct((b, _LANE), jnp.float32),
        grid_spec=pltpu.PrefetchScalarGridSpec(
            num_scalar_prefetch=0,
            grid=(gb, gm),
            in_specs=[
                pl.BlockSpec((tb, tm, _LANE), lambda i, j: (i, j, 0)),
                pl.BlockSpec((tb, tm, _LANE), lambda i, j: (i, j, 0)),
            ],
            out_specs=pl.BlockSpec((tb, _LANE), lambda i, j: (i, 0)),
            scratch_shapes=[
                pltpu.VMEM((tb, _LANE), jnp.float32),   # running intersection
                pltpu.VMEM((tb, _LANE), jnp.float32),   # running sum(p) + sum(t)
            ],
        ),
        compiler_params=pltpu.CompilerParams(
            dimension_semantics=("parallel", "arbitrary"),
            vmem_limit_bytes=32 * 1024 * 1024,
            allow_input_fusion=[True, True] if padded else None,
        ),
        cost_estimate=cost,
    )(p, t)

    # Tiny glue-level mean over the batch of per-sample (1 - IoU).
    return jnp.mean(per_sample[:, 0])


def _ref_iou(pred, target):
    axes = tuple(range(1, pred.ndim))
    pf = pred.astype(jnp.float32)
    tf = target.astype(jnp.float32)
    iand = jnp.sum(pf * tf, axis=axes)
    ior = jnp.sum(tf, axis=axes) + jnp.sum(pf, axis=axes) - iand
    return jnp.mean(1.0 - iand / ior)


if __name__ == "__main__":
    key = jax.random.PRNGKey(0)
    ks = jax.random.split(key, 8)

    # Case 1: small images -> whole-sample blocks with multiple samples batched
    # per grid step (single reduction step).
    B, C, H, W = 2, 4, 16, 16
    pred = jax.nn.sigmoid(jax.random.normal(ks[0], (B, C, H, W), dtype=jnp.float32))
    target = (jax.random.uniform(ks[1], (B, C, H, W)) > 0.5).astype(jnp.float32)
    loss = iou_loss(pred, target)
    jax.block_until_ready(loss)
    ref = _ref_iou(pred, target)
    assert jnp.allclose(loss, ref, rtol=1e-5, atol=1e-5), (loss, ref)

    # Case 2: force tiny blocks to exercise the tiled reduction, the resident
    # VMEM vector accumulator and the mask-only-on-last-tile path
    # (m = 18 rows, tm = 8 -> 3 reduction steps, ragged tail of 2 rows).
    pred2 = jax.nn.sigmoid(jax.random.normal(ks[2], (2, 4, 24, 24), dtype=jnp.float32))
    target2 = (jax.random.uniform(ks[3], (2, 4, 24, 24)) > 0.5).astype(jnp.float32)
    loss2 = iou_loss(pred2, target2, block_rows=8)
    jax.block_until_ready(loss2)
    ref2 = _ref_iou(pred2, target2)
    assert jnp.allclose(loss2, ref2, rtol=1e-5, atol=1e-5), (loss2, ref2)

    # Case 3: per-sample size not a multiple of 128 (n = 969), run under jit so
    # the tiny zero pad may fuse into the pallas_call (allow_input_fusion).
    pred3 = jax.nn.sigmoid(jax.random.normal(ks[4], (2, 3, 17, 19), dtype=jnp.float32))
    target3 = (jax.random.uniform(ks[5], (2, 3, 17, 19)) > 0.5).astype(jnp.float32)
    loss3 = jax.jit(iou_loss)(pred3, target3)
    jax.block_until_ready(loss3)
    ref3 = _ref_iou(pred3, target3)
    assert jnp.allclose(loss3, ref3, rtol=1e-5, atol=1e-5), (loss3, ref3)

    # Case 4: bf16 inputs (native bf16 elementwise, f32 accumulation).
    pred4 = pred.astype(jnp.bfloat16)
    target4 = target.astype(jnp.bfloat16)
    loss4 = iou_loss(pred4, target4)
    jax.block_until_ready(loss4)
    ref4 = _ref_iou(pred4, target4)
    assert jnp.allclose(loss4, ref4, rtol=2e-2, atol=2e-2), (loss4, ref4)

    print("KERNEL_OK")
</pallas_src>

<mosaic_0001>
module attributes {stable_mosaic.version = 11 : i64} {
  func.func @kernel(%arg0: i32, %arg1: i32, %arg2: memref<2x8x128xf32, #tpu.memory_space<vmem>>, %arg3: memref<2x8x128xf32, #tpu.memory_space<vmem>>, %arg4: memref<2x128xf32, #tpu.memory_space<vmem>>, %arg5: memref<2x128xf32, #tpu.memory_space<vmem>>, %arg6: memref<2x128xf32, #tpu.memory_space<vmem>>) attributes {dimension_semantics = [#tpu.dimension_semantics<parallel>, #tpu.dimension_semantics<arbitrary>], iteration_bounds = array<i64: 1, 1>, scalar_prefetch = 0 : i64, scratch_operands = 2 : i64, tpu.core_type = #tpu.core_type<tc>, window_params = [{transform_indices = @transform_0, window_bounds = array<i64: 2, 8, 128>}, {transform_indices = @transform_1, window_bounds = array<i64: 2, 8, 128>}, {transform_indices = @transform_2, window_bounds = array<i64: 2, 128>}]} {
    %c0_i32 = arith.constant 0 : i32
    %0 = arith.cmpi eq, %arg1, %c0_i32 : i32
    %1 = arith.extui %0 : i1 to i32
    %c0_i32_0 = arith.constant 0 : i32
    %2 = arith.cmpi ne, %1, %c0_i32_0 : i32
    scf.if %2 {
      %cst_17 = arith.constant 0.000000e+00 : f32
      %18 = vector.broadcast %cst_17 : f32 to vector<2x128xf32>
      %c0_18 = arith.constant 0 : index
      %c0_19 = arith.constant 0 : index
      %19 = vector.load %arg5[%c0_18, %c0_19] : memref<2x128xf32, #tpu.memory_space<vmem>>, vector<2x128xf32>
      tpu.vector_store %arg5[%c0_18, %c0_19], %18 {strides = array<i32>} : memref<2x128xf32, #tpu.memory_space<vmem>>, vector<2x128xf32>,
      %cst_20 = arith.constant 0.000000e+00 : f32
      %20 = vector.broadcast %cst_20 : f32 to vector<2x128xf32>
      %c0_21 = arith.constant 0 : index
      %c0_22 = arith.constant 0 : index
      %21 = vector.load %arg6[%c0_21, %c0_22] : memref<2x128xf32, #tpu.memory_space<vmem>>, vector<2x128xf32>
      tpu.vector_store %arg6[%c0_21, %c0_22], %20 {strides = array<i32>} : memref<2x128xf32, #tpu.memory_space<vmem>>, vector<2x128xf32>,
    } else {
    }
    %c0 = arith.constant 0 : index
    %c0_1 = arith.constant 0 : index
    %c0_2 = arith.constant 0 : index
    %3 = vector.load %arg2[%c0, %c0_1, %c0_2] : memref<2x8x128xf32, #tpu.memory_space<vmem>>, vector<2x8x128xf32>
    %c0_3 = arith.constant 0 : index
    %c0_4 = arith.constant 0 : index
    %c0_5 = arith.constant 0 : index
    %4 = vector.load %arg3[%c0_3, %c0_4, %c0_5] : memref<2x8x128xf32, #tpu.memory_space<vmem>>, vector<2x8x128xf32>
    %5 = arith.mulf %3, %4 : vector<2x8x128xf32>
    %6 = arith.addf %3, %4 : vector<2x8x128xf32>
    %cst = arith.constant dense<0.000000e+00> : vector<2x128xf32>
    %7 = vector.multi_reduction <add>, %5, %cst [1] : vector<2x8x128xf32> to vector<2x128xf32>
    %cst_6 = arith.constant dense<0.000000e+00> : vector<2x128xf32>
    %8 = vector.multi_reduction <add>, %6, %cst_6 [1] : vector<2x8x128xf32> to vector<2x128xf32>
    %c0_7 = arith.constant 0 : index
    %c0_8 = arith.constant 0 : index
    %9 = vector.load %arg5[%c0_7, %c0_8] : memref<2x128xf32, #tpu.memory_space<vmem>>, vector<2x128xf32>
    %10 = arith.addf %9, %7 : vector<2x128xf32>
    %c0_9 = arith.constant 0 : index
    %c0_10 = arith.constant 0 : index
    %11 = vector.load %arg5[%c0_9, %c0_10] : memref<2x128xf32, #tpu.memory_space<vmem>>, vector<2x128xf32>
    tpu.vector_store %arg5[%c0_9, %c0_10], %10 {strides = array<i32>} : memref<2x128xf32, #tpu.memory_space<vmem>>, vector<2x128xf32>,
    %c0_11 = arith.constant 0 : index
    %c0_12 = arith.constant 0 : index
    %12 = vector.load %arg6[%c0_11, %c0_12] : memref<2x128xf32, #tpu.memory_space<vmem>>, vector<2x128xf32>
    %13 = arith.addf %12, %8 : vector<2x128xf32>
    %c0_13 = arith.constant 0 : index
    %c0_14 = arith.constant 0 : index
    %14 = vector.load %arg6[%c0_13, %c0_14] : memref<2x128xf32, #tpu.memory_space<vmem>>, vector<2x128xf32>
    tpu.vector_store %arg6[%c0_13, %c0_14], %13 {strides = array<i32>} : memref<2x128xf32, #tpu.memory_space<vmem>>, vector<2x128xf32>,
    %c0_i32_15 = arith.constant 0 : i32
    %15 = arith.cmpi eq, %arg1, %c0_i32_15 : i32
    %16 = arith.extui %15 : i1 to i32
    %c0_i32_16 = arith.constant 0 : i32
    %17 = arith.cmpi ne, %16, %c0_i32_16 : i32
    scf.if %17 {
      %c0_17 = arith.constant 0 : index
      %c0_18 = arith.constant 0 : index
      %18 = vector.load %arg5[%c0_17, %c0_18] : memref<2x128xf32, #tpu.memory_space<vmem>>, vector<2x128xf32>
      %cst_19 = arith.constant dense<0.000000e+00> : vector<2xf32>
      %19 = vector.multi_reduction <add>, %18, %cst_19 [1] : vector<2x128xf32> to vector<2xf32>
      %20 = vector.shape_cast %19 : vector<2xf32> to vector<2x1xf32>
      %c0_20 = arith.constant 0 : index
      %c0_21 = arith.constant 0 : index
      %21 = vector.load %arg6[%c0_20, %c0_21] : memref<2x128xf32, #tpu.memory_space<vmem>>, vector<2x128xf32>
      %cst_22 = arith.constant dense<0.000000e+00> : vector<2xf32>
      %22 = vector.multi_reduction <add>, %21, %cst_22 [1] : vector<2x128xf32> to vector<2xf32>
      %23 = vector.shape_cast %22 : vector<2xf32> to vector<2x1xf32>
      %24 = arith.subf %23, %20 : vector<2x1xf32>
      %25 = arith.divf %20, %24 : vector<2x1xf32>
      %cst_23 = arith.constant 1.000000e+00 : f32
      %26 = vector.broadcast %cst_23 : f32 to vector<2x1xf32>
      %27 = arith.subf %26, %25 : vector<2x1xf32>
      %28 = vector.shape_cast %27 : vector<2x1xf32> to vector<2x1xf32>
      %29 = vector.broadcast %28 : vector<2x1xf32> to vector<2x128xf32>
      %c0_24 = arith.constant 0 : index
      %c0_25 = arith.constant 0 : index
      %30 = vector.load %arg4[%c0_24, %c0_25] : memref<2x128xf32, #tpu.memory_space<vmem>>, vector<2x128xf32>
      tpu.vector_store %arg4[%c0_24, %c0_25], %29 {strides = array<i32>} : memref<2x128xf32, #tpu.memory_space<vmem>>, vector<2x128xf32>,
    } else {
    }
    return
  }
  func.func @transform_0(%arg0: i32, %arg1: i32) -> (i32, i32, i32) {
    %c0_i32 = arith.constant 0 : i32
    %c0_i32_0 = arith.constant 0 : i32
    return %arg0, %arg1, %c0_i32 : i32, i32, i32
  }
  func.func @transform_1(%arg0: i32, %arg1: i32) -> (i32, i32, i32) {
    %c0_i32 = arith.constant 0 : i32
    %c0_i32_0 = arith.constant 0 : i32
    return %arg0, %arg1, %c0_i32 : i32, i32, i32
  }
  func.func @transform_2(%arg0: i32, %arg1: i32) -> (i32, i32) {
    %c0_i32 = arith.constant 0 : i32
    %c0_i32_0 = arith.constant 0 : i32
    return %arg0, %c0_i32 : i32, i32
  }
}

</mosaic_0001>

<bundles_post_ra>
// kernel: tpu_custom_call.1
= control target key start
LH: loop header
LB: loop body
LE: loop exit
PB: predicated region body
PF: predicated region fallthrough
CT: control target
= control target key end

     0   :  { %7 = vsyncpa [#allocation5], 0  ;;  %s263_s0 = inlined_call_operand.hbm [shape: f32[2,8,128], index: 0, kind: input, shape index: {}]   ;;  %s264_s1 = inlined_call_operand.hbm [shape: f32[2,8,128], index: 1, kind: input, shape index: {}]   ;;  %s265_s2 = inlined_call_operand.hbm [shape: f32[2,128], index: 2, kind: output, shape index: {}]  }
   0x1   :  { %8 = vsyncpa [#allocation8], 0 }
   0x2   :  { %9 = vsyncpa [#allocation6], 0  ;;  %s206_s9 = smov [#allocation4]   ;;  %s134_s13 = scalar_lea.hbm %s263_s0, 256 }
   0x3   :  { %s15_s10 = sshll.u32 %s206_s9, 4  ;;  %p135_p0 = scmp.ne.s32.totalorder %s263_s0, %s134_s13  ;;  %s16_s10 = int_to_ptr.vmem [resolvable:$true] %s15_s10 }
   0x4   :  { %p138_p1 = scmp.lt.u32.totalorder %s134_s13, %s263_s0 }
   0x6   :  { %p140_p2 = pnand %p138_p1, %p135_p0 }
   0x8   :  { %143 = shalt.err (!%p140_p2)
}
   0x9   :  { %s144_s18 = scalar_lea.vmem %s16_s10, 256  ;;  %p149_p4 = scmp.lt.s32.totalorder %s16_s10, %s16_s10 }
   0xa   :  { %p145_p3 = scmp.ne.s32.totalorder %s16_s10, %s144_s18  ;;  %p150_p5 = scmp.lt.s32.totalorder %s144_s18, %s144_s18 }
   0xc   :  { %p151_p6 = por %p150_p5, %p149_p4 }
   0xe   :  { %p152_p7 = pnand %p151_p6, %p145_p3 }
  0x10   :  { %155 = shalt.err (!%p152_p7)
}
  0x11   :  { %s207_s19 = smov 128   ;;  %s208_s20 = smov 8  }
  0x12   :  { %21 = dma.hbm_to_vmem [thread:$0]  %s263_s0, 256, %s16_s10, [#allocation5], %s207_s19, %s207_s19, %s208_s20  }
  0x13   :  { %s209_s23 = smov [#allocation7]   ;;  %s156_s27 = scalar_lea.hbm %s264_s1, 256 }
  0x14   :  { %s27_s24 = sshll.u32 %s209_s23, 4  ;;  %p157_p8 = scmp.ne.s32.totalorder %s264_s1, %s156_s27  ;;  %s28_s24 = int_to_ptr.vmem [resolvable:$true] %s27_s24 }
  0x15   :  { %p160_p9 = scmp.lt.u32.totalorder %s156_s27, %s264_s1 }
  0x17   :  { %p162_p10 = pnand %p160_p9, %p157_p8 }
  0x19   :  { %165 = shalt.err (!%p162_p10)
}
  0x1a   :  { %s166_s4 = scalar_lea.vmem %s28_s24, 256  ;;  %p171_p12 = scmp.lt.s32.totalorder %s28_s24, %s28_s24 }
  0x1b   :  { %p167_p11 = scmp.ne.s32.totalorder %s28_s24, %s166_s4  ;;  %p172_p13 = scmp.lt.s32.totalorder %s166_s4, %s166_s4 }
  0x1d   :  { %p173_p0 = por %p172_p13, %p171_p12 }
  0x1f   :  { %p174_p1 = pnand %p173_p0, %p167_p11 }
  0x21   :  { %177 = shalt.err (!%p174_p1)
}
  0x22   :  { %33 = dma.hbm_to_vmem [thread:$0]  %s264_s1, 256, %s28_s24, [#allocation8], %s207_s19, %s207_s19, %s208_s20  }
  0x23   :  { %200 = dma.done.wait [#allocation5], 256  }
  0x24   :  { %201 = vsyncadd [#allocation5], 4294967040 }
  0x25   :  { %202 = dma.done.wait [#allocation8], 256  }
  0x26   :  { %203 = vsyncadd [#allocation8], 4294967040  ;;  %v210_v0 = vmov 0.0   ;;  %v46_v1 = vld [vmem:[#allocation4] sm:$0xff]  ;;  %v47_v2 = vld [vmem:[#allocation4 + $0x8] sm:$0xff]  ;;  %vm81_vm0 = vcmask 1041409  }
  0x27   :  { %44 = vst [vmem:[#allocation2] sm:$0x3] %v210_v0  ;;  %45 = vst [vmem:[#allocation3] sm:$0x3] %v210_v0  ;;  %v48_v3 = vld [vmem:[#allocation7] sm:$0xff]  ;;  %v49_v4 = vld [vmem:[#allocation7 + $0x8] sm:$0xff] }
  0x28   :  { %v50_v5 = vmul.f32 %v48_v3, %v46_v1  ;;  %v52_v6 = vadd.f32 %v48_v3, %v46_v1  ;;  %v51_v7 = vmul.f32 %v49_v4, %v47_v2  ;;  %v53_v8 = vadd.f32 %v49_v4, %v47_v2  ;;  %s211_s1 = smov [#allocation9]  }
  0x29   :  { %vm97_vm1 = vcmask 1041408   ;;  %s116_s6 = sshll.u32 %s211_s1, 4  ;;  %s117_s6 = int_to_ptr.vmem [resolvable:$true] %s116_s6 }
  0x2a   :  { %v54_v9 = vrot.slane %v50_v5, 4  ;;  %v66_v10 = vrot.slane %v52_v6, 4  ;;  %v60_v11 = vrot.slane %v51_v7, 4  ;;  %v72_v12 = vrot.slane %v53_v8, 4  ;;  %s178_s7 = scalar_lea.vmem %s117_s6, 32  ;;  %p183_p3 = scmp.lt.s32.totalorder %s117_s6, %s117_s6 }
  0x2b   :  { %p179_p2 = scmp.ne.s32.totalorder %s117_s6, %s178_s7  ;;  %p184_p4 = scmp.lt.s32.totalorder %s178_s7, %s178_s7 }
  0x2c   :  { %v55_v13 = vadd.f32 %v54_v9, %v50_v5  ;;  %v67_v14 = vadd.f32 %v66_v10, %v52_v6  ;;  %v61_v15 = vadd.f32 %v60_v11, %v51_v7  ;;  %v73_v16 = vadd.f32 %v72_v12, %v53_v8 }
  0x2d   :  { %p185_p5 = por %p184_p4, %p183_p3 }
  0x2e   :  { %v56_v17 = vrot.slane %v55_v13, 2  ;;  %v68_v18 = vrot.slane %v67_v14, 2  ;;  %v62_v19 = vrot.slane %v61_v15, 2  ;;  %v74_v20 = vrot.slane %v73_v16, 2  ;;  %v78_v32 = vld [vmem:[#allocation2] sm:$0x3] }
  0x2f   :  { %v86_v34 = vld [vmem:[#allocation3] sm:$0x3]  ;;  %p186_p6 = pnand %p185_p5, %p179_p2 }
  0x30   :  { %v57_v21 = vadd.f32 %v56_v17, %v55_v13  ;;  %v69_v22 = vadd.f32 %v68_v18, %v67_v14  ;;  %v63_v23 = vadd.f32 %v62_v19, %v61_v15  ;;  %v75_v24 = vadd.f32 %v74_v20, %v73_v16 }
  0x32   :  { %v58_v25 = vrot.slane %v57_v21, 1  ;;  %v70_v26 = vrot.slane %v69_v22, 1  ;;  %v64_v27 = vrot.slane %v63_v23, 1  ;;  %v76_v28 = vrot.slane %v75_v24, 1 }
  0x34   :  { %v59_v29 = vadd.f32 %v58_v25, %v57_v21  ;;  %v71_v30 = vadd.f32 %v70_v26, %v69_v22  ;;  %v65_v31 = vadd.f32 %v64_v27, %v63_v23  ;;  %v77_v33 = vadd.f32 %v76_v28, %v75_v24 }
  0x36   :  { %v82_v35 = vsel %vm81_vm0, %v65_v31, %v59_v29  ;;  %v89_v36 = vsel %vm81_vm0, %v77_v33, %v71_v30 }
  0x37   :  { %v84_v37 = vadd.f32 %v82_v35, %v78_v32  ;;  %v91_v38 = vadd.f32 %v89_v36, %v86_v34 }
  0x39   :  { %85 = vst [vmem:[#allocation2] sm:$0x3] %v84_v37  ;;  %92 = vst [vmem:[#allocation3] sm:$0x3] %v91_v38 }
  0x40   :  { %v96_v39 = vld [vmem:[#allocation2] sm:$0x3]  ;;  %v101_v40 = vld [vmem:[#allocation3] sm:$0x3] }
  0x41   :  { %v98_v41 = vsel %vm97_vm1, %v96_v39, 0.0  ;;  %v102_v42 = vsel %vm97_vm1, %v101_v40, 0.0 }
  0x42   :  { %99 = vadd.xlane.f32.xlu0 %v98_v41 }
  0x46   :  { %103 = vadd.xlane.f32.xlu0 %v102_v42 }
  0xcf   :  { %v100_v43 = vpop.xlane.xlu0 %99 }
  0xd3   :  { %v104_v44 = vpop.xlane.xlu0 %103 }
  0xd4   :  { %v105_v45 = vsub.f32 %v104_v44, %v100_v43 }
  0xd6   :  { %132 = vrcp.f32 %v105_v45 }
  0xe0   :  { %v133_v46 = vpop.eup %132 }
  0xe1   :  { %v107_v47 = vmul.f32 %v133_v46, %v100_v43 }
  0xe3   :  { %v108_v48 = vsub.f32 1.0, %v107_v47 }
  0xe5   :  { %109 = vst [vmem:[#allocation9] sm:$0x3] %v108_v48 }
  0xe6   :  { %189 = shalt.err (!%p186_p6)
}
  0xe7   :  { %s190_s10 = scalar_lea.hbm %s265_s2, 32 }
  0xe8   :  { %p191_p7 = scmp.ne.s32.totalorder %s265_s2, %s190_s10  ;;  %p194_p8 = scmp.lt.u32.totalorder %s190_s10, %s265_s2 }
  0xea   :  { %p196_p9 = pnand %p194_p8, %p191_p7 }
  0xec   :  { %199 = shalt.err (!%p196_p9)
}
  0xed   :  { %119 = dma.vmem_to_hbm [thread:$0]  %s117_s6, 32, %s265_s2, [#allocation6]  }
  0xee   :  { %204 = dma.done.wait [#allocation6], 32  }
  0xef   :  { %205 = vsyncadd [#allocation6], 4294967264 }
  0xf0   :  { %123 = vsyncpa [#allocation5], 1 }
  0xf1   :  { %124 = vsyncpa [#allocation8], 1 }
  0xf2   :  { %125 = vsyncpa [#allocation6], 1 }

</bundles_post_ra>
